<compile_context>
chip_gen: v7x
topology: tpu7x:2x2x1
jax: 0.10.0
libtpu: 0.0.40
codegen_flags: <defaults>
</compile_context>

<pallas_src>
import math

import jax
import jax.numpy as jnp
from jax.experimental import pallas as pl
from jax.experimental.pallas import tpu as pltpu

_SQRT_2_OVER_PI = math.sqrt(2.0 / math.pi)


def _gelu_new(x):
    # GPT-2 "gelu_new": 0.5*x*(1 + tanh(sqrt(2/pi)*(x + 0.044715*x^3)))
    x3 = x * x * x  # VPU muls; keeps the single EUP port free for the tanh
    return 0.5 * x * (1.0 + jnp.tanh(_SQRT_2_OVER_PI * (x + 0.044715 * x3)))


# ----------------------------- kernels --------------------------------------


def _mlp_kernel_resident(x_ref, wfc_ref, bfc_ref, wproj_ref, bproj_ref, o_ref):
    """Weights VMEM-resident (constant block index); 1-D grid over row tiles."""
    w_dtype = wfc_ref.dtype
    x = x_ref[...].astype(w_dtype)                                       # [tm, H]
    h = jnp.dot(x, wfc_ref[...], preferred_element_type=jnp.float32)     # [tm, I]
    h = _gelu_new(h + bfc_ref[...].astype(jnp.float32))                  # f32 math
    out = jnp.dot(h.astype(w_dtype), wproj_ref[...],
                  preferred_element_type=jnp.float32)                    # [tm, H]
    o_ref[...] = (out + bproj_ref[...].astype(jnp.float32)).astype(o_ref.dtype)


def _mlp_kernel_stream(x_ref, wfc_ref, bfc_ref, wproj_ref, bproj_ref, o_ref,
                       acc_ref):
    """Weights streamed along the intermediate (I) axis; grid = (row, I) tiles."""
    k = pl.program_id(1)
    w_dtype = wfc_ref.dtype
    x = x_ref[...].astype(w_dtype)                                       # [tm, H]
    h = jnp.dot(x, wfc_ref[...], preferred_element_type=jnp.float32)     # [tm, ti]
    h = _gelu_new(h + bfc_ref[...].astype(jnp.float32))
    part = jnp.dot(h.astype(w_dtype), wproj_ref[...],
                   preferred_element_type=jnp.float32)                   # [tm, H]

    @pl.when(k == 0)
    def _assign():                       # assign (not zero-fill then accumulate)
        acc_ref[...] = part

    @pl.when(k > 0)
    def _accumulate():
        acc_ref[...] += part

    @pl.when(k == pl.num_programs(1) - 1)
    def _finalize():
        o_ref[...] = (acc_ref[...]
                      + bproj_ref[...].astype(jnp.float32)).astype(o_ref.dtype)


# --------------------------- tiling helpers ----------------------------------


def _round_up(x, m):
    return ((x + m - 1) // m) * m


def _tpu_hw_info():
    """(vmem_capacity_bytes, num_tensorcores) with conservative fallbacks."""
    kind = ""
    try:
        kind = jax.devices()[0].device_kind.lower()
    except Exception:
        pass
    is_v7 = ("7x" in kind) or ("v7" in kind)
    vmem = None
    try:
        vmem = int(getattr(pltpu.get_tpu_info(), "vmem_capacity_bytes"))
    except Exception:
        vmem = None
    if vmem is None or vmem <= 0:
        if is_v7:
            vmem = 64 << 20
        elif ("v5" in kind) or ("v6" in kind):
            vmem = 128 << 20
        else:
            vmem = 64 << 20                  # unknown: be conservative
    vmem = max(32 << 20, min(vmem, 128 << 20))
    num_cores = 2 if is_v7 else 1
    return vmem, num_cores


def _pick_inner_tile(I, target):
    """Largest multiple of 128 dividing I, near `target` (a bit above allowed)."""
    if I <= target or I % 128 != 0:
        return I
    start = max(128, (int(target * 1.25) // 128) * 128)
    for cand in range(start, 127, -128):
        if I % cand == 0:
            return cand
    return I


def _pick_row_tile(M, fits, *, tm_max, min_tiles, tile_overhead_rows):
    """Row tile: multiple of 16, fits VMEM, minimizes padded rows + per-tile cost."""
    M16 = _round_up(max(M, 1), 16)
    cands = {c for c in (1024, 768, 512, 384, 256, 192, 128, 96, 64, 48, 32, 16)
             if c <= tm_max}
    if M16 <= tm_max:
        cands.add(M16)                       # ragged-M friendly single-tile option
    cands = sorted(cands, reverse=True)
    feasible = [c for c in cands if fits(c)] or [min(cands)]
    pool = [c for c in feasible if -(-M // c) >= min_tiles] or feasible

    def cost(c):
        n = -(-M // c)
        # padded rows processed + per-tile overhead (weight re-stream when streaming)
        return (n * c + n * tile_overhead_rows, -c)

    return min(pool, key=cost)


def _vmem_need_stream(tm, ti, H, I, w_bytes, x_bytes, o_bytes):
    weights = 2 * 2 * H * ti * w_bytes                  # double-buffered wfc/wproj slices
    biases = 2 * ti * w_bytes + 2 * H * w_bytes
    io = 2 * tm * H * (x_bytes + o_bytes)               # double-buffered x / out tiles
    acc = tm * H * 4                                    # f32 accumulator scratch
    interm = tm * ti * (4 + w_bytes) + tm * H * w_bytes  # f32 h + casts for the MXU
    return weights + biases + io + acc + interm


def _vmem_need_resident(tm, H, I, w_bytes, x_bytes, o_bytes, weight_bufs):
    weights = weight_bufs * (2 * H * I + I + H) * w_bytes
    io = 2 * tm * H * (x_bytes + o_bytes)
    interm = tm * I * (4 + w_bytes) + tm * H * w_bytes
    return weights + io + interm


# ------------------------------- wrapper --------------------------------------


def gpt2_mlp(hidden_states, w_fc, b_fc, w_proj, b_proj, *,
             weight_resident=None, tm=None, ti=None):
    """hidden_states: [B,S,H]; w_fc: [H,I]; b_fc: [I]; w_proj: [I,H]; b_proj: [H]."""
    B, S, H = hidden_states.shape
    Hw, I = w_fc.shape
    assert Hw == H and w_proj.shape == (I, H)
    assert b_fc.shape == (I,) and b_proj.shape == (H,)
    M = B * S

    x2d = hidden_states.reshape(M, H)
    b_fc2 = b_fc.reshape(1, I)
    b_proj2 = b_proj.reshape(1, H)

    w_bytes = w_fc.dtype.itemsize
    x_bytes = x2d.dtype.itemsize
    o_bytes = x_bytes

    vmem_cap, num_cores = _tpu_hw_info()
    hard_cap = min(vmem_cap - (8 << 20), 100 << 20)     # headroom below physical VMEM
    budget = int(hard_cap * 0.9)
    min_tiles = num_cores                               # v7x: keep both TCs busy

    resident_fits = _vmem_need_resident(128, H, I, w_bytes, x_bytes, o_bytes, 1) <= budget
    if weight_resident is None:
        # Resident weights only where VMEM is roomy (128 MiB v5e/v6e); stream on v7x.
        use_resident = resident_fits and num_cores == 1
    else:
        use_resident = bool(weight_resident) and resident_fits

    if use_resident:
        tm_max = 1024 if tm is None else max(16, int(tm))
        ti_sel = I
        n_k = 1

        def fits(c):
            return _vmem_need_resident(c, H, I, w_bytes, x_bytes, o_bytes, 1) <= budget

        tm_sel = _pick_row_tile(M, fits, tm_max=tm_max, min_tiles=min_tiles,
                                tile_overhead_rows=16)
        vmem_need = _vmem_need_resident(tm_sel, H, I, w_bytes, x_bytes, o_bytes, 1)
    else:
        ti_sel = _pick_inner_tile(I, 512 if ti is None else int(ti))
        n_k = I // ti_sel
        tm_max_default = 512 if (num_cores >= 2 or vmem_cap <= (64 << 20)) else 1024
        tm_max = tm_max_default if tm is None else max(16, int(tm))

        def fits(c):
            return _vmem_need_stream(c, ti_sel, H, I, w_bytes, x_bytes, o_bytes) <= budget

        tm_sel = _pick_row_tile(M, fits, tm_max=tm_max, min_tiles=min_tiles,
                                tile_overhead_rows=384)
        vmem_need = _vmem_need_stream(tm_sel, ti_sel, H, I, w_bytes, x_bytes, o_bytes)

    M_pad = _round_up(M, tm_sel)
    n_m = M_pad // tm_sel
    if M_pad != M:
        x2d = jnp.pad(x2d, ((0, M_pad - M), (0, 0)))

    vmem_limit = int(min(hard_cap, max(32 << 20, int(vmem_need * 1.2) + (4 << 20))))

    if use_resident:
        bytes_accessed = ((2 * H * I + I + H) * w_bytes
                          + M_pad * H * (x_bytes + o_bytes))
    else:
        bytes_accessed = (n_m * (2 * H * I + I) * w_bytes + H * w_bytes
                          + M_pad * H * (x_bytes + o_bytes))

    cost = pl.CostEstimate(
        flops=4 * M_pad * I * H,                 # two matmuls of 2*M*I*H flops each
        transcendentals=M_pad * I,               # one tanh per expanded element
        bytes_accessed=int(bytes_accessed),
    )

    out_shape = jax.ShapeDtypeStruct((M_pad, H), hidden_states.dtype)
    x_spec = None  # placeholder for readability below

    if use_resident:
        def run(single_buffer):
            def wspec(shape):
                if single_buffer:
                    return pl.BlockSpec(shape, lambda i: (0, 0),
                                        pipeline_mode=pl.Buffered(1))
                return pl.BlockSpec(shape, lambda i: (0, 0))

            res = pl.pallas_call(
                _mlp_kernel_resident,
                out_shape=out_shape,
                grid_spec=pltpu.PrefetchScalarGridSpec(
                    num_scalar_prefetch=0,
                    grid=(n_m,),
                    in_specs=[
                        pl.BlockSpec((tm_sel, H), lambda i: (i, 0)),  # x row tile
                        wspec((H, I)),                                # w_fc (resident)
                        wspec((1, I)),                                # b_fc (resident)
                        wspec((I, H)),                                # w_proj (resident)
                        wspec((1, H)),                                # b_proj (resident)
                    ],
                    out_specs=pl.BlockSpec((tm_sel, H), lambda i: (i, 0)),
                ),
                compiler_params=pltpu.CompilerParams(
                    dimension_semantics=("parallel",),
                    vmem_limit_bytes=vmem_limit,
                ),
                cost_estimate=cost,
            )(x2d, w_fc, b_fc2, w_proj, b_proj2)
            return jax.block_until_ready(res)

        try:
            out = run(True)                      # single-buffered resident weights
        except Exception:
            out = run(False)                     # fallback: default double buffering
    else:
        out = pl.pallas_call(
            _mlp_kernel_stream,
            out_shape=out_shape,
            grid_spec=pltpu.PrefetchScalarGridSpec(
                num_scalar_prefetch=0,
                grid=(n_m, n_k),
                in_specs=[
                    pl.BlockSpec((tm_sel, H), lambda i, k: (i, 0)),   # x row tile
                    pl.BlockSpec((H, ti_sel), lambda i, k: (0, k)),   # w_fc I-slice
                    pl.BlockSpec((1, ti_sel), lambda i, k: (0, k)),   # b_fc I-slice
                    pl.BlockSpec((ti_sel, H), lambda i, k: (k, 0)),   # w_proj I-slice
                    pl.BlockSpec((1, H), lambda i, k: (0, 0)),        # b_proj (invariant)
                ],
                out_specs=pl.BlockSpec((tm_sel, H), lambda i, k: (i, 0)),
                scratch_shapes=[pltpu.VMEM((tm_sel, H), jnp.float32)],
            ),
            compiler_params=pltpu.CompilerParams(
                dimension_semantics=("parallel", "arbitrary"),
                vmem_limit_bytes=vmem_limit,
            ),
            cost_estimate=cost,
        )(x2d, w_fc, b_fc2, w_proj, b_proj2)

    if M_pad != M:
        out = out[:M]
    return out.reshape(B, S, H)


def gpt2_mlp_ref(hidden_states, w_fc, b_fc, w_proj, b_proj):
    f32 = jnp.float32
    h = hidden_states.astype(f32) @ w_fc.astype(f32) + b_fc.astype(f32)
    h = _gelu_new(h)
    return h @ w_proj.astype(f32) + b_proj.astype(f32)


if __name__ == "__main__":
    # --- Test 1: toy GPT-2 shape (B=2, S=8, H=32, I=128), f32, auto mode.
    B, S, H = 2, 8, 32
    I = 4 * H
    key = jax.random.PRNGKey(0)
    kx, kfc, kproj = jax.random.split(key, 3)

    x = jax.random.normal(kx, (B, S, H), dtype=jnp.float32)
    w_fc = 0.02 * jax.random.normal(kfc, (H, I), dtype=jnp.float32)
    b_fc = jnp.zeros((I,), dtype=jnp.float32)
    w_proj = 0.02 * jax.random.normal(kproj, (I, H), dtype=jnp.float32)
    b_proj = jnp.zeros((H,), dtype=jnp.float32)

    out = jax.block_until_ready(gpt2_mlp(x, w_fc, b_fc, w_proj, b_proj))
    ref = gpt2_mlp_ref(x, w_fc, b_fc, w_proj, b_proj)
    assert out.shape == (B, S, H)
    assert jnp.allclose(out, ref, atol=1e-5, rtol=1e-5), "toy f32 mismatch"

    # --- Test 2: larger shape, forced streaming mode (exercises the I-reduction
    #             grid axis with assign/accumulate + finalize), f32.
    B2, S2, H2 = 2, 128, 256
    I2 = 4 * H2
    k2 = jax.random.split(jax.random.PRNGKey(1), 3)
    x2 = jax.random.normal(k2[0], (B2, S2, H2), dtype=jnp.float32)
    wfc2 = 0.02 * jax.random.normal(k2[1], (H2, I2), dtype=jnp.float32)
    bfc2 = 0.1 * jnp.ones((I2,), dtype=jnp.float32)
    wproj2 = 0.02 * jax.random.normal(k2[2], (I2, H2), dtype=jnp.float32)
    bproj2 = 0.1 * jnp.ones((H2,), dtype=jnp.float32)

    out2 = jax.block_until_ready(
        gpt2_mlp(x2, wfc2, bfc2, wproj2, bproj2, weight_resident=False))
    ref2 = gpt2_mlp_ref(x2, wfc2, bfc2, wproj2, bproj2)
    assert jnp.allclose(out2, ref2, atol=5e-3, rtol=5e-3), "streaming f32 mismatch"

    # --- Test 3: bf16 weights, auto mode (resident on 128 MiB parts).
    out3 = jax.block_until_ready(
        gpt2_mlp(x2,
                 wfc2.astype(jnp.bfloat16), bfc2.astype(jnp.bfloat16),
                 wproj2.astype(jnp.bfloat16), bproj2.astype(jnp.bfloat16)))
    assert jnp.allclose(out3, ref2, atol=2e-2, rtol=2e-2), "bf16 auto mismatch"

    # --- Test 4: ragged M (B=2, S=67 -> M=134), bf16 weights, forced streaming
    #             (exercises padding-aware tm choice + slicing the pad off).
    B4, S4 = 2, 67
    x4 = jax.random.normal(jax.random.PRNGKey(2), (B4, S4, H2), dtype=jnp.float32)
    out4 = jax.block_until_ready(
        gpt2_mlp(x4,
                 wfc2.astype(jnp.bfloat16), bfc2.astype(jnp.bfloat16),
                 wproj2.astype(jnp.bfloat16), bproj2.astype(jnp.bfloat16),
                 weight_resident=False))
    ref4 = gpt2_mlp_ref(x4, wfc2, bfc2, wproj2, bproj2)
    assert out4.shape == (B4, S4, H2)
    assert jnp.allclose(out4, ref4, atol=2e-2, rtol=2e-2), "ragged bf16 mismatch"

    print("KERNEL_OK")
</pallas_src>

<mosaic_0001>
module attributes {stable_mosaic.version = 11 : i64} {
  func.func @_mlp_kernel_resident(%arg0: i32, %arg1: memref<16x32xf32, #tpu.memory_space<vmem>>, %arg2: memref<32x128xf32, #tpu.memory_space<vmem>>, %arg3: memref<1x128xf32, #tpu.memory_space<vmem>>, %arg4: memref<128x32xf32, #tpu.memory_space<vmem>>, %arg5: memref<1x32xf32, #tpu.memory_space<vmem>>, %arg6: memref<16x32xf32, #tpu.memory_space<vmem>>) attributes {dimension_semantics = [#tpu.dimension_semantics<parallel>], iteration_bounds = array<i64: 1>, scalar_prefetch = 0 : i64, scratch_operands = 0 : i64, tpu.core_type = #tpu.core_type<tc>, window_params = [{transform_indices = @transform_0, window_bounds = array<i64: 16, 32>}, {pipeline_mode = #tpu.pipeline_mode<synchronous>, transform_indices = @transform_1, window_bounds = array<i64: 32, 128>}, {pipeline_mode = #tpu.pipeline_mode<synchronous>, transform_indices = @transform_2, window_bounds = array<i64: 1, 128>}, {pipeline_mode = #tpu.pipeline_mode<synchronous>, transform_indices = @transform_3, window_bounds = array<i64: 128, 32>}, {pipeline_mode = #tpu.pipeline_mode<synchronous>, transform_indices = @transform_4, window_bounds = array<i64: 1, 32>}, {transform_indices = @transform_5, window_bounds = array<i64: 16, 32>}]} {
    %c0 = arith.constant 0 : index
    %c0_0 = arith.constant 0 : index
    %0 = vector.load %arg1[%c0, %c0_0] : memref<16x32xf32, #tpu.memory_space<vmem>>, vector<16x32xf32>
    %c0_1 = arith.constant 0 : index
    %c0_2 = arith.constant 0 : index
    %1 = vector.load %arg2[%c0_1, %c0_2] : memref<32x128xf32, #tpu.memory_space<vmem>>, vector<32x128xf32>
    %cst = arith.constant dense<0.000000e+00> : vector<16x128xf32>
    %2 = tpu.matmul %0, %1, %cst {dimension_numbers = #tpu.dot_dimension_numbers<[1], [0], [0], [1], [0, 0, 1, 1], [], []>} : vector<16x32xf32>, vector<32x128xf32>, vector<16x128xf32> -> vector<16x128xf32>
    %c0_3 = arith.constant 0 : index
    %c0_4 = arith.constant 0 : index
    %3 = vector.load %arg3[%c0_3, %c0_4] : memref<1x128xf32, #tpu.memory_space<vmem>>, vector<1x128xf32>
    %4 = vector.broadcast %3 : vector<1x128xf32> to vector<16x128xf32>
    %5 = arith.addf %2, %4 : vector<16x128xf32>
    %6 = arith.mulf %5, %5 : vector<16x128xf32>
    %7 = arith.mulf %6, %5 : vector<16x128xf32>
    %cst_5 = arith.constant 5.000000e-01 : f32
    %8 = vector.broadcast %cst_5 : f32 to vector<16x128xf32>
    %9 = arith.mulf %8, %5 : vector<16x128xf32>
    %cst_6 = arith.constant 4.471500e-02 : f32
    %10 = vector.broadcast %cst_6 : f32 to vector<16x128xf32>
    %11 = arith.mulf %10, %7 : vector<16x128xf32>
    %12 = arith.addf %5, %11 : vector<16x128xf32>
    %cst_7 = arith.constant 0.797884583 : f32
    %13 = vector.broadcast %cst_7 : f32 to vector<16x128xf32>
    %14 = arith.mulf %13, %12 : vector<16x128xf32>
    %15 = math.tanh %14 : vector<16x128xf32>
    %cst_8 = arith.constant 1.000000e+00 : f32
    %16 = vector.broadcast %cst_8 : f32 to vector<16x128xf32>
    %17 = arith.addf %16, %15 : vector<16x128xf32>
    %18 = arith.mulf %9, %17 : vector<16x128xf32>
    %c0_9 = arith.constant 0 : index
    %c0_10 = arith.constant 0 : index
    %19 = vector.load %arg4[%c0_9, %c0_10] : memref<128x32xf32, #tpu.memory_space<vmem>>, vector<128x32xf32>
    %cst_11 = arith.constant dense<0.000000e+00> : vector<16x32xf32>
    %20 = tpu.matmul %18, %19, %cst_11 {dimension_numbers = #tpu.dot_dimension_numbers<[1], [0], [0], [1], [0, 0, 1, 1], [], []>} : vector<16x128xf32>, vector<128x32xf32>, vector<16x32xf32> -> vector<16x32xf32>
    %c0_12 = arith.constant 0 : index
    %c0_13 = arith.constant 0 : index
    %21 = vector.load %arg5[%c0_12, %c0_13] : memref<1x32xf32, #tpu.memory_space<vmem>>, vector<1x32xf32>
    %22 = vector.broadcast %21 : vector<1x32xf32> to vector<16x32xf32>
    %23 = arith.addf %20, %22 : vector<16x32xf32>
    %c0_14 = arith.constant 0 : index
    %c0_15 = arith.constant 0 : index
    %24 = vector.load %arg6[%c0_14, %c0_15] : memref<16x32xf32, #tpu.memory_space<vmem>>, vector<16x32xf32>
    tpu.vector_store %arg6[%c0_14, %c0_15], %23 {strides = array<i32>} : memref<16x32xf32, #tpu.memory_space<vmem>>, vector<16x32xf32>,
    return
  }
  func.func @transform_0(%arg0: i32) -> (i32, i32) {
    %c0_i32 = arith.constant 0 : i32
    %c0_i32_0 = arith.constant 0 : i32
    return %arg0, %c0_i32 : i32, i32
  }
  func.func @transform_1(%arg0: i32) -> (i32, i32) {
    %c0_i32 = arith.constant 0 : i32
    %c0_i32_0 = arith.constant 0 : i32
    %c0_i32_1 = arith.constant 0 : i32
    return %c0_i32, %c0_i32_0 : i32, i32
  }
  func.func @transform_2(%arg0: i32) -> (i32, i32) {
    %c0_i32 = arith.constant 0 : i32
    %c0_i32_0 = arith.constant 0 : i32
    %c0_i32_1 = arith.constant 0 : i32
    return %c0_i32, %c0_i32_0 : i32, i32
  }
  func.func @transform_3(%arg0: i32) -> (i32, i32) {
    %c0_i32 = arith.constant 0 : i32
    %c0_i32_0 = arith.constant 0 : i32
    %c0_i32_1 = arith.constant 0 : i32
    return %c0_i32, %c0_i32_0 : i32, i32
  }
  func.func @transform_4(%arg0: i32) -> (i32, i32) {
    %c0_i32 = arith.constant 0 : i32
    %c0_i32_0 = arith.constant 0 : i32
    %c0_i32_1 = arith.constant 0 : i32
    return %c0_i32, %c0_i32_0 : i32, i32
  }
  func.func @transform_5(%arg0: i32) -> (i32, i32) {
    %c0_i32 = arith.constant 0 : i32
    %c0_i32_0 = arith.constant 0 : i32
    return %arg0, %c0_i32 : i32, i32
  }
}

module attributes {stable_mosaic.version = 11 : i64} {
  func.func @_mlp_kernel_resident(%arg0: i32, %arg1: memref<16x32xf32, #tpu.memory_space<vmem>>, %arg2: memref<32x128xf32, #tpu.memory_space<vmem>>, %arg3: memref<1x128xf32, #tpu.memory_space<vmem>>, %arg4: memref<128x32xf32, #tpu.memory_space<vmem>>, %arg5: memref<1x32xf32, #tpu.memory_space<vmem>>, %arg6: memref<16x32xf32, #tpu.memory_space<vmem>>) attributes {dimension_semantics = [#tpu.dimension_semantics<parallel>], iteration_bounds = array<i64: 1>, scalar_prefetch = 0 : i64, scratch_operands = 0 : i64, tpu.core_type = #tpu.core_type<tc>, window_params = [{transform_indices = @transform_0, window_bounds = array<i64: 16, 32>}, {pipeline_mode = #tpu.pipeline_mode<synchronous>, transform_indices = @transform_1, window_bounds = array<i64: 32, 128>}, {pipeline_mode = #tpu.pipeline_mode<synchronous>, transform_indices = @transform_2, window_bounds = array<i64: 1, 128>}, {pipeline_mode = #tpu.pipeline_mode<synchronous>, transform_indices = @transform_3, window_bounds = array<i64: 128, 32>}, {pipeline_mode = #tpu.pipeline_mode<synchronous>, transform_indices = @transform_4, window_bounds = array<i64: 1, 32>}, {transform_indices = @transform_5, window_bounds = array<i64: 16, 32>}]} {
    %c0 = arith.constant 0 : index
    %c0_0 = arith.constant 0 : index
    %0 = vector.load %arg1[%c0, %c0_0] : memref<16x32xf32, #tpu.memory_space<vmem>>, vector<16x32xf32>
    %c0_1 = arith.constant 0 : index
    %c0_2 = arith.constant 0 : index
    %1 = vector.load %arg2[%c0_1, %c0_2] : memref<32x128xf32, #tpu.memory_space<vmem>>, vector<32x128xf32>
    %cst = arith.constant dense<0.000000e+00> : vector<16x128xf32>
    %2 = tpu.matmul %0, %1, %cst {dimension_numbers = #tpu.dot_dimension_numbers<[1], [0], [0], [1], [0, 0, 1, 1], [], []>} : vector<16x32xf32>, vector<32x128xf32>, vector<16x128xf32> -> vector<16x128xf32>
    %c0_3 = arith.constant 0 : index
    %c0_4 = arith.constant 0 : index
    %3 = vector.load %arg3[%c0_3, %c0_4] : memref<1x128xf32, #tpu.memory_space<vmem>>, vector<1x128xf32>
    %4 = vector.broadcast %3 : vector<1x128xf32> to vector<16x128xf32>
    %5 = arith.addf %2, %4 : vector<16x128xf32>
    %6 = arith.mulf %5, %5 : vector<16x128xf32>
    %7 = arith.mulf %6, %5 : vector<16x128xf32>
    %cst_5 = arith.constant 5.000000e-01 : f32
    %8 = vector.broadcast %cst_5 : f32 to vector<16x128xf32>
    %9 = arith.mulf %8, %5 : vector<16x128xf32>
    %cst_6 = arith.constant 4.471500e-02 : f32
    %10 = vector.broadcast %cst_6 : f32 to vector<16x128xf32>
    %11 = arith.mulf %10, %7 : vector<16x128xf32>
    %12 = arith.addf %5, %11 : vector<16x128xf32>
    %cst_7 = arith.constant 0.797884583 : f32
    %13 = vector.broadcast %cst_7 : f32 to vector<16x128xf32>
    %14 = arith.mulf %13, %12 : vector<16x128xf32>
    %15 = math.tanh %14 : vector<16x128xf32>
    %cst_8 = arith.constant 1.000000e+00 : f32
    %16 = vector.broadcast %cst_8 : f32 to vector<16x128xf32>
    %17 = arith.addf %16, %15 : vector<16x128xf32>
    %18 = arith.mulf %9, %17 : vector<16x128xf32>
    %c0_9 = arith.constant 0 : index
    %c0_10 = arith.constant 0 : index
    %19 = vector.load %arg4[%c0_9, %c0_10] : memref<128x32xf32, #tpu.memory_space<vmem>>, vector<128x32xf32>
    %cst_11 = arith.constant dense<0.000000e+00> : vector<16x32xf32>
    %20 = tpu.matmul %18, %19, %cst_11 {dimension_numbers = #tpu.dot_dimension_numbers<[1], [0], [0], [1], [0, 0, 1, 1], [], []>} : vector<16x128xf32>, vector<128x32xf32>, vector<16x32xf32> -> vector<16x32xf32>
    %c0_12 = arith.constant 0 : index
    %c0_13 = arith.constant 0 : index
    %21 = vector.load %arg5[%c0_12, %c0_13] : memref<1x32xf32, #tpu.memory_space<vmem>>, vector<1x32xf32>
    %22 = vector.broadcast %21 : vector<1x32xf32> to vector<16x32xf32>
    %23 = arith.addf %20, %22 : vector<16x32xf32>
    %c0_14 = arith.constant 0 : index
    %c0_15 = arith.constant 0 : index
    %24 = vector.load %arg6[%c0_14, %c0_15] : memref<16x32xf32, #tpu.memory_space<vmem>>, vector<16x32xf32>
    tpu.vector_store %arg6[%c0_14, %c0_15], %23 {strides = array<i32>} : memref<16x32xf32, #tpu.memory_space<vmem>>, vector<16x32xf32>,
    return
  }
  func.func @transform_0(%arg0: i32) -> (i32, i32) {
    %c0_i32 = arith.constant 0 : i32
    %c0_i32_0 = arith.constant 0 : i32
    return %arg0, %c0_i32 : i32, i32
  }
  func.func @transform_1(%arg0: i32) -> (i32, i32) {
    %c0_i32 = arith.constant 0 : i32
    %c0_i32_0 = arith.constant 0 : i32
    %c0_i32_1 = arith.constant 0 : i32
    return %c0_i32, %c0_i32_0 : i32, i32
  }
  func.func @transform_2(%arg0: i32) -> (i32, i32) {
    %c0_i32 = arith.constant 0 : i32
    %c0_i32_0 = arith.constant 0 : i32
    %c0_i32_1 = arith.constant 0 : i32
    return %c0_i32, %c0_i32_0 : i32, i32
  }
  func.func @transform_3(%arg0: i32) -> (i32, i32) {
    %c0_i32 = arith.constant 0 : i32
    %c0_i32_0 = arith.constant 0 : i32
    %c0_i32_1 = arith.constant 0 : i32
    return %c0_i32, %c0_i32_0 : i32, i32
  }
  func.func @transform_4(%arg0: i32) -> (i32, i32) {
    %c0_i32 = arith.constant 0 : i32
    %c0_i32_0 = arith.constant 0 : i32
    %c0_i32_1 = arith.constant 0 : i32
    return %c0_i32, %c0_i32_0 : i32, i32
  }
  func.func @transform_5(%arg0: i32) -> (i32, i32) {
    %c0_i32 = arith.constant 0 : i32
    %c0_i32_0 = arith.constant 0 : i32
    return %arg0, %c0_i32 : i32, i32
  }
}

</mosaic_0001>

<bundles_post_ra>
// kernel: tpu_custom_call.1
= control target key start
LH: loop header
LB: loop body
LE: loop exit
PB: predicated region body
PF: predicated region fallthrough
CT: control target
= control target key end

     0   :  { %vm34_vm0 = vcmask 261120   ;;  %s516_s0 = inlined_call_operand.vmem [shape: f32[16,32], index: 0, kind: input, shape index: {}]   ;;  %s517_s1 = inlined_call_operand.vmem [shape: f32[32,128], index: 1, kind: input, shape index: {}]   ;;  %s518_s2 = inlined_call_operand.vmem [shape: f32[1,128], index: 2, kind: input, shape index: {}]   ;;  %s519_s3 = inlined_call_operand.vmem [shape: f32[128,32], index: 3, kind: input, shape index: {}]   ;;  %s520_s4 = inlined_call_operand.vmem [shape: f32[1,32], index: 4, kind: input, shape index: {}]   ;;  %s521_s5 = inlined_call_operand.hbm [shape: f32[16,32], index: 5, kind: output, shape index: {}]  }
   0x1   :  { %v23_v0 = vld [vmem:[%s517_s1] sm:$0xff]  ;;  %v24_v1 = vld [vmem:[%s517_s1 + $0x8] sm:$0xff]  ;;  %v25_v2 = vld [vmem:[%s517_s1 + $0x10] sm:$0xff] }
   0x2   :  { %v324_v3 = vpack.c.bf16 %v24_v1, %v23_v0  ;;  %v26_v4 = vld [vmem:[%s517_s1 + $0x18] sm:$0xff]  ;;  %v21_v5 = vld [vmem:[%s516_s0] sm:$0xff]  ;;  %v135_v8 = vld [vmem:[%s519_s3 + $0x8] sm:$0xff] }
   0x3   :  { %v328_v6 = vpack.c.bf16 %v26_v4, %v25_v2  ;;  %286 = vmatprep.mubr.msk.f32.mxu0 %vm34_vm0, %v21_v5  ;;  %v134_v7 = vld [vmem:[%s519_s3] sm:$0xff] }
   0x4   :  { %10 = vsyncpa [#allocation3], 0  ;;  %325 = vmatprep.subr.bf16.mxu0 %v324_v3  ;;  %v332_v9 = vpack.c.bf16 %v135_v8, %v134_v7  ;;  %v22_v10 = vld [vmem:[%s516_s0 + $0x8] sm:$0xff]  ;;  %v136_v11 = vld [vmem:[%s519_s3 + $0x10] sm:$0xff]  ;;  %s395_s11 = smov [#allocation2]  }
   0x5   :  { %327 = vmatpush3.bf16.msra.mxu0 %v324_v3  ;;  %v137_v12 = vld [vmem:[%s519_s3 + $0x18] sm:$0xff]  ;;  %v138_v14 = vld [vmem:[%s519_s3 + $0x20] sm:$0xff]  ;;  %v139_v15 = vld [vmem:[%s519_s3 + $0x28] sm:$0xff]  ;;  %s239_s12 = sshll.u32 %s395_s11, 4  ;;  %s240_s12 = int_to_ptr.vmem [resolvable:$true] %s239_s12 }
   0x6   :  { %329 = vmatprep.subr.bf16.mxu0 %v328_v6  ;;  %333 = vmatprep.subr.bf16.mxu1 %v332_v9  ;;  %v336_v13 = vpack.c.bf16 %v137_v12, %v136_v11  ;;  %v340_v16 = vpack.c.bf16 %v139_v15, %v138_v14  ;;  %v140_v17 = vld [vmem:[%s519_s3 + $0x30] sm:$0xff]  ;;  %v141_v18 = vld [vmem:[%s519_s3 + $0x38] sm:$0xff]  ;;  %v142_v20 = vld [vmem:[%s519_s3 + $0x40] sm:$0xff]  ;;  %s371_s13 = scalar_lea.vmem %s240_s12, 256  ;;  %p376_p1 = scmp.lt.s32.totalorder %s240_s12, %s240_s12 }
   0x7   :  { %335 = vmatpush3.bf16.msra.mxu1 %v332_v9  ;;  %v344_v19 = vpack.c.bf16 %v141_v18, %v140_v17  ;;  %v143_v21 = vld [vmem:[%s519_s3 + $0x48] sm:$0xff]  ;;  %v144_v22 = vld [vmem:[%s519_s3 + $0x50] sm:$0xff]  ;;  %v145_v24 = vld [vmem:[%s519_s3 + $0x58] sm:$0xff]  ;;  %p372_p0 = scmp.ne.s32.totalorder %s240_s12, %s371_s13  ;;  %p377_p2 = scmp.lt.s32.totalorder %s371_s13, %s371_s13 }
   0x8   :  { %337 = vmatprep.subr.bf16.mxu1 %v336_v13  ;;  %v348_v23 = vpack.c.bf16 %v143_v21, %v142_v20  ;;  %v352_v25 = vpack.c.bf16 %v145_v24, %v144_v22  ;;  %v146_v26 = vld [vmem:[%s519_s3 + $0x60] sm:$0xff]  ;;  %v147_v27 = vld [vmem:[%s519_s3 + $0x68] sm:$0xff]  ;;  %v148_v29 = vld [vmem:[%s519_s3 + $0x70] sm:$0xff] }
   0x9   :  { %331 = vmatpush3.bf16.msra.mxu0 %v328_v6  ;;  %v356_v28 = vpack.c.bf16 %v147_v27, %v146_v26  ;;  %v149_v30 = vld [vmem:[%s519_s3 + $0x78] sm:$0xff]  ;;  %v250_v32 = vld [vmem:[%s518_s2] ss:$0 sm:$0xff]  ;;  %p378_p3 = por %p377_p2, %p376_p1 }
   0xa   :  { %v360_v31 = vpack.c.bf16 %v149_v30, %v148_v29  ;;  %v253_v55 = vld [vmem:[%s520_s4] ss:$0 sm:$0xff] }
   0xb   :  { %339 = vmatpush3.bf16.msra.mxu1 %v336_v13  ;;  %p379_p4 = pnand %p378_p3, %p372_p0 }
   0xc   :  { %287 = vmatmul.mubr.msk.f32.vlgmr.msra.gmra.mrb[0].mxu0 %vm34_vm0, %v22_v10  ;;  %341 = vmatprep.subr.bf16.mxu1 %v340_v16 }
   0xf   :  { %343 = vmatpush3.bf16.msra.mxu1 %v340_v16 }
  0x10   :  { %345 = vmatprep.subr.bf16.mxu1 %v344_v19 }
  0x13   :  { %347 = vmatpush3.bf16.msra.mxu1 %v344_v19 }
  0x14   :  { %349 = vmatprep.subr.bf16.mxu1 %v348_v23 }
  0x17   :  { %351 = vmatpush3.bf16.msra.mxu1 %v348_v23 }
  0x18   :  { %353 = vmatprep.subr.bf16.mxu1 %v352_v25 }
  0x1b   :  { %355 = vmatpush3.bf16.msra.mxu1 %v352_v25 }
  0x1c   :  { %357 = vmatprep.subr.bf16.mxu1 %v356_v28 }
  0x1f   :  { %359 = vmatpush3.bf16.msra.mxu1 %v356_v28 }
  0x20   :  { %361 = vmatprep.subr.bf16.mxu1 %v360_v31 }
  0x23   :  { %363 = vmatpush3.bf16.msra.mxu1 %v360_v31 }
  0xdf   :  { %v288_v33 = vpop.f32.mrb[0].mxu0 }
  0xe0   :  { %v113_v34 = vadd.f32 %v288_v33, %v250_v32  ;;  %v107_v35 = vpop.f32.mrb[1].mxu0 }
  0xe1   :  { %v108_v36 = vadd.f32 %v250_v32, %v107_v35 }
  0xe2   :  { %v117_v37 = vmul.f32 %v113_v34, %v113_v34  ;;  %v121_v52 = vmul.f32 0.5, %v113_v34 }
  0xe3   :  { %v116_v38 = vmul.f32 %v108_v36, %v108_v36  ;;  %v120_v50 = vmul.f32 0.5, %v108_v36 }
  0xe4   :  { %v119_v39 = vmul.f32 %v117_v37, %v113_v34 }
  0xe5   :  { %v118_v40 = vmul.f32 %v116_v38, %v108_v36 }
  0xe6   :  { %v123_v41 = vmul.f32 0.044715, %v119_v39 }
  0xe7   :  { %v122_v42 = vmul.f32 0.044715, %v118_v40 }
  0xe8   :  { %v125_v43 = vadd.f32 %v123_v41, %v113_v34 }
  0xe9   :  { %v124_v44 = vadd.f32 %v122_v42, %v108_v36 }
  0xea   :  { %v127_v45 = vmul.f32 0.7978846, %v125_v43 }
  0xeb   :  { %v126_v46 = vmul.f32 0.7978846, %v124_v44 }
  0xec   :  { %367 = vtanh.f32 %v127_v45 }
  0xed   :  { %369 = vtanh.f32 %v126_v46 }
  0xf6   :  { %v368_v47 = vpop.eup %367 }
  0xf7   :  { %v370_v48 = vpop.eup %369  ;;  %v131_v49 = vadd.f32 1.0, %v368_v47 }
  0xf8   :  { %v130_v51 = vadd.f32 1.0, %v370_v48 }
  0xf9   :  { %v133_v54 = vmul.f32 %v131_v49, %v121_v52 }
  0xfa   :  { %v132_v53 = vmul.f32 %v130_v51, %v120_v50 }
  0xfc   :  { %321 = vmatprep.mubr.f32.mxu1 %v132_v53 }
  0xfd   :  { %322 = vmatmul.mubr.f32.vlgmr.msra.gmra.mrb[0].mxu1 %v133_v54 }
 0x1d0   :  { %v323_v56 = vpop.f32.mrb[0].mxu1 }
 0x1d1   :  { %v229_v57 = vadd.f32 %v323_v56, %v253_v55  ;;  %v223_v58 = vpop.f32.mrb[1].mxu1 }
 0x1d2   :  { %v224_v59 = vadd.f32 %v253_v55, %v223_v58 }
 0x1d3   :  { %233 = vst.msk [vmem:[#allocation2 + $0x8] sm:$0xff] %vm34_vm0, %v229_v57 }
 0x1d4   :  { %232 = vst.msk [vmem:[#allocation2] sm:$0xff] %vm34_vm0, %v224_v59 }
 0x1d5   :  { %382 = shalt.err (!%p379_p4)
}
 0x1d6   :  { %s383_s15 = scalar_lea.hbm %s521_s5, 256 }
 0x1d7   :  { %p384_p5 = scmp.ne.s32.totalorder %s521_s5, %s383_s15  ;;  %p387_p6 = scmp.lt.u32.totalorder %s383_s15, %s521_s5 }
 0x1d9   :  { %p389_p7 = pnand %p387_p6, %p384_p5 }
 0x1db   :  { %392 = shalt.err (!%p389_p7)
}
 0x1dc   :  { %s396_s19 = smov 128   ;;  %s397_s20 = smov 8  }
 0x1dd   :  { %245 = dma.vmem_to_hbm [thread:$0]  %s240_s12, 256, %s521_s5, [#allocation3], %s396_s19, %s396_s19, %s397_s20  }
 0x1de   :  { %393 = dma.done.wait [#allocation3], 256  }
 0x1df   :  { %394 = vsyncadd [#allocation3], 4294967040 }
 0x1e0   :  { %249 = vsyncpa [#allocation3], 1 }

// kernel: tpu_custom_call.1
= control target key start
LH: loop header
LB: loop body
LE: loop exit
PB: predicated region body
PF: predicated region fallthrough
CT: control target
= control target key end

     0   :  { %vm34_vm0 = vcmask 261120   ;;  %s516_s0 = inlined_call_operand.vmem [shape: f32[16,32], index: 0, kind: input, shape index: {}]   ;;  %s517_s1 = inlined_call_operand.vmem [shape: f32[32,128], index: 1, kind: input, shape index: {}]   ;;  %s518_s2 = inlined_call_operand.vmem [shape: f32[1,128], index: 2, kind: input, shape index: {}]   ;;  %s519_s3 = inlined_call_operand.vmem [shape: f32[128,32], index: 3, kind: input, shape index: {}]   ;;  %s520_s4 = inlined_call_operand.vmem [shape: f32[1,32], index: 4, kind: input, shape index: {}]   ;;  %s521_s5 = inlined_call_operand.hbm [shape: f32[16,32], index: 5, kind: output, shape index: {}]  }
   0x1   :  { %v23_v0 = vld [vmem:[%s517_s1] sm:$0xff]  ;;  %v24_v1 = vld [vmem:[%s517_s1 + $0x8] sm:$0xff]  ;;  %v25_v2 = vld [vmem:[%s517_s1 + $0x10] sm:$0xff] }
   0x2   :  { %v324_v3 = vpack.c.bf16 %v24_v1, %v23_v0  ;;  %v26_v4 = vld [vmem:[%s517_s1 + $0x18] sm:$0xff]  ;;  %v21_v5 = vld [vmem:[%s516_s0] sm:$0xff]  ;;  %v135_v8 = vld [vmem:[%s519_s3 + $0x8] sm:$0xff] }
   0x3   :  { %v328_v6 = vpack.c.bf16 %v26_v4, %v25_v2  ;;  %286 = vmatprep.mubr.msk.f32.mxu0 %vm34_vm0, %v21_v5  ;;  %v134_v7 = vld [vmem:[%s519_s3] sm:$0xff] }
   0x4   :  { %10 = vsyncpa [#allocation3], 0  ;;  %325 = vmatprep.subr.bf16.mxu0 %v324_v3  ;;  %v332_v9 = vpack.c.bf16 %v135_v8, %v134_v7  ;;  %v22_v10 = vld [vmem:[%s516_s0 + $0x8] sm:$0xff]  ;;  %v136_v11 = vld [vmem:[%s519_s3 + $0x10] sm:$0xff]  ;;  %s395_s11 = smov [#allocation2]  }
   0x5   :  { %327 = vmatpush3.bf16.msra.mxu0 %v324_v3  ;;  %v137_v12 = vld [vmem:[%s519_s3 + $0x18] sm:$0xff]  ;;  %v138_v14 = vld [vmem:[%s519_s3 + $0x20] sm:$0xff]  ;;  %v139_v15 = vld [vmem:[%s519_s3 + $0x28] sm:$0xff]  ;;  %s239_s12 = sshll.u32 %s395_s11, 4  ;;  %s240_s12 = int_to_ptr.vmem [resolvable:$true] %s239_s12 }
   0x6   :  { %329 = vmatprep.subr.bf16.mxu0 %v328_v6  ;;  %333 = vmatprep.subr.bf16.mxu1 %v332_v9  ;;  %v336_v13 = vpack.c.bf16 %v137_v12, %v136_v11  ;;  %v340_v16 = vpack.c.bf16 %v139_v15, %v138_v14  ;;  %v140_v17 = vld [vmem:[%s519_s3 + $0x30] sm:$0xff]  ;;  %v141_v18 = vld [vmem:[%s519_s3 + $0x38] sm:$0xff]  ;;  %v142_v20 = vld [vmem:[%s519_s3 + $0x40] sm:$0xff]  ;;  %s371_s13 = scalar_lea.vmem %s240_s12, 256  ;;  %p376_p1 = scmp.lt.s32.totalorder %s240_s12, %s240_s12 }
   0x7   :  { %335 = vmatpush3.bf16.msra.mxu1 %v332_v9  ;;  %v344_v19 = vpack.c.bf16 %v141_v18, %v140_v17  ;;  %v143_v21 = vld [vmem:[%s519_s3 + $0x48] sm:$0xff]  ;;  %v144_v22 = vld [vmem:[%s519_s3 + $0x50] sm:$0xff]  ;;  %v145_v24 = vld [vmem:[%s519_s3 + $0x58] sm:$0xff]  ;;  %p372_p0 = scmp.ne.s32.totalorder %s240_s12, %s371_s13  ;;  %p377_p2 = scmp.lt.s32.totalorder %s371_s13, %s371_s13 }
   0x8   :  { %337 = vmatprep.subr.bf16.mxu1 %v336_v13  ;;  %v348_v23 = vpack.c.bf16 %v143_v21, %v142_v20  ;;  %v352_v25 = vpack.c.bf16 %v145_v24, %v144_v22  ;;  %v146_v26 = vld [vmem:[%s519_s3 + $0x60] sm:$0xff]  ;;  %v147_v27 = vld [vmem:[%s519_s3 + $0x68] sm:$0xff]  ;;  %v148_v29 = vld [vmem:[%s519_s3 + $0x70] sm:$0xff] }
   0x9   :  { %331 = vmatpush3.bf16.msra.mxu0 %v328_v6  ;;  %v356_v28 = vpack.c.bf16 %v147_v27, %v146_v26  ;;  %v149_v30 = vld [vmem:[%s519_s3 + $0x78] sm:$0xff]  ;;  %v250_v32 = vld [vmem:[%s518_s2] ss:$0 sm:$0xff]  ;;  %p378_p3 = por %p377_p2, %p376_p1 }
   0xa   :  { %v360_v31 = vpack.c.bf16 %v149_v30, %v148_v29  ;;  %v253_v55 = vld [vmem:[%s520_s4] ss:$0 sm:$0xff] }
   0xb   :  { %339 = vmatpush3.bf16.msra.mxu1 %v336_v13  ;;  %p379_p4 = pnand %p378_p3, %p372_p0 }
   0xc   :  { %287 = vmatmul.mubr.msk.f32.vlgmr.msra.gmra.mrb[0].mxu0 %vm34_vm0, %v22_v10  ;;  %341 = vmatprep.subr.bf16.mxu1 %v340_v16 }
   0xf   :  { %343 = vmatpush3.bf16.msra.mxu1 %v340_v16 }
  0x10   :  { %345 = vmatprep.subr.bf16.mxu1 %v344_v19 }
  0x13   :  { %347 = vmatpush3.bf16.msra.mxu1 %v344_v19 }
  0x14   :  { %349 = vmatprep.subr.bf16.mxu1 %v348_v23 }
  0x17   :  { %351 = vmatpush3.bf16.msra.mxu1 %v348_v23 }
  0x18   :  { %353 = vmatprep.subr.bf16.mxu1 %v352_v25 }
  0x1b   :  { %355 = vmatpush3.bf16.msra.mxu1 %v352_v25 }
  0x1c   :  { %357 = vmatprep.subr.bf16.mxu1 %v356_v28 }
  0x1f   :  { %359 = vmatpush3.bf16.msra.mxu1 %v356_v28 }
  0x20   :  { %361 = vmatprep.subr.bf16.mxu1 %v360_v31 }
  0x23   :  { %363 = vmatpush3.bf16.msra.mxu1 %v360_v31 }
  0xdf   :  { %v288_v33 = vpop.f32.mrb[0].mxu0 }
  0xe0   :  { %v113_v34 = vadd.f32 %v288_v33, %v250_v32  ;;  %v107_v35 = vpop.f32.mrb[1].mxu0 }
  0xe1   :  { %v108_v36 = vadd.f32 %v250_v32, %v107_v35 }
  0xe2   :  { %v117_v37 = vmul.f32 %v113_v34, %v113_v34  ;;  %v121_v52 = vmul.f32 0.5, %v113_v34 }
  0xe3   :  { %v116_v38 = vmul.f32 %v108_v36, %v108_v36  ;;  %v120_v50 = vmul.f32 0.5, %v108_v36 }
  0xe4   :  { %v119_v39 = vmul.f32 %v117_v37, %v113_v34 }
  0xe5   :  { %v118_v40 = vmul.f32 %v116_v38, %v108_v36 }
  0xe6   :  { %v123_v41 = vmul.f32 0.044715, %v119_v39 }
  0xe7   :  { %v122_v42 = vmul.f32 0.044715, %v118_v40 }
  0xe8   :  { %v125_v43 = vadd.f32 %v123_v41, %v113_v34 }
  0xe9   :  { %v124_v44 = vadd.f32 %v122_v42, %v108_v36 }
  0xea   :  { %v127_v45 = vmul.f32 0.7978846, %v125_v43 }
  0xeb   :  { %v126_v46 = vmul.f32 0.7978846, %v124_v44 }
  0xec   :  { %367 = vtanh.f32 %v127_v45 }
  0xed   :  { %369 = vtanh.f32 %v126_v46 }
  0xf6   :  { %v368_v47 = vpop.eup %367 }
  0xf7   :  { %v370_v48 = vpop.eup %369  ;;  %v131_v49 = vadd.f32 1.0, %v368_v47 }
  0xf8   :  { %v130_v51 = vadd.f32 1.0, %v370_v48 }
  0xf9   :  { %v133_v54 = vmul.f32 %v131_v49, %v121_v52 }
  0xfa   :  { %v132_v53 = vmul.f32 %v130_v51, %v120_v50 }
  0xfc   :  { %321 = vmatprep.mubr.f32.mxu1 %v132_v53 }
  0xfd   :  { %322 = vmatmul.mubr.f32.vlgmr.msra.gmra.mrb[0].mxu1 %v133_v54 }
 0x1d0   :  { %v323_v56 = vpop.f32.mrb[0].mxu1 }
 0x1d1   :  { %v229_v57 = vadd.f32 %v323_v56, %v253_v55  ;;  %v223_v58 = vpop.f32.mrb[1].mxu1 }
 0x1d2   :  { %v224_v59 = vadd.f32 %v253_v55, %v223_v58 }
 0x1d3   :  { %233 = vst.msk [vmem:[#allocation2 + $0x8] sm:$0xff] %vm34_vm0, %v229_v57 }
 0x1d4   :  { %232 = vst.msk [vmem:[#allocation2] sm:$0xff] %vm34_vm0, %v224_v59 }
 0x1d5   :  { %382 = shalt.err (!%p379_p4)
}
 0x1d6   :  { %s383_s15 = scalar_lea.hbm %s521_s5, 256 }
 0x1d7   :  { %p384_p5 = scmp.ne.s32.totalorder %s521_s5, %s383_s15  ;;  %p387_p6 = scmp.lt.u32.totalorder %s383_s15, %s521_s5 }
 0x1d9   :  { %p389_p7 = pnand %p387_p6, %p384_p5 }
 0x1db   :  { %392 = shalt.err (!%p389_p7)
}
 0x1dc   :  { %s396_s19 = smov 128   ;;  %s397_s20 = smov 8  }
 0x1dd   :  { %245 = dma.vmem_to_hbm [thread:$0]  %s240_s12, 256, %s521_s5, [#allocation3], %s396_s19, %s396_s19, %s397_s20  }
 0x1de   :  { %393 = dma.done.wait [#allocation3], 256  }
 0x1df   :  { %394 = vsyncadd [#allocation3], 4294967040 }
 0x1e0   :  { %249 = vsyncpa [#allocation3], 1 }

</bundles_post_ra>
